<compile_context>
chip_gen: v6e
topology: v6e:2x2x1
jax: 0.10.0
libtpu: 0.0.40
codegen_flags: <defaults>
</compile_context>

<pallas_src>
import math

import jax
import jax.numpy as jnp
from jax.experimental import pallas as pl
from jax.experimental.pallas import tpu as pltpu


def _round_up(x, m):
    return ((x + m - 1) // m) * m


def _nbytes(shape, dtype):
    return int(math.prod(shape)) * jnp.dtype(dtype).itemsize


def _vmem_capacity_bytes():
    try:
        return int(pltpu.get_tpu_info().vmem_capacity_bytes)
    except Exception:
        return 64 << 20          # conservative: v7x per-TensorCore VMEM


# ---------------------------------------------------------------------------
# Pallas kernel: fused  (x @ W1 + b1) -> gelu -> (@ W2_tile + b2_tile)
# Grid = (M tiles, N2 tiles).  The post-GELU hidden is computed once per M
# tile (j == 0) into VMEM scratch (already in W2's dtype) and reused for every
# streamed W2 column tile.
# ---------------------------------------------------------------------------
def projector_kernel(x_ref, w1_ref, b1_ref, w2_ref, b2_ref, o_ref, h_ref):
    j = pl.program_id(1)

    @pl.when(j == 0)
    def _():
        # linear_1: storage-dtype (bf16) operands, f32 MXU accumulation.
        h = jnp.dot(x_ref[...], w1_ref[...], preferred_element_type=jnp.float32)
        h = h + b1_ref[...]                                   # b1 is f32
        # exact erf GELU (matches torch.nn.functional.gelu default); cast ONCE
        # to W2's dtype when writing the scratch.
        g = 0.5 * h * (1.0 + jax.lax.erf(h * (1.0 / math.sqrt(2.0))))
        h_ref[...] = g.astype(h_ref.dtype)

    # linear_2 on this N2 tile (hidden is already in W2's dtype -> no recast).
    y = jnp.dot(h_ref[...], w2_ref[...], preferred_element_type=jnp.float32)
    y = y + b2_ref[...]                                       # b2 is f32
    o_ref[...] = y.astype(o_ref.dtype)


def _call_projector(x2d, w1, b1, w2, b2, *, tm, tn, out_dtype, vmem_limit,
                    single_buffer_resident):
    M, K = x2d.shape
    N1p = w1.shape[1]
    N2p = w2.shape[1]
    # Resident operands (constant index_map) need no double buffering.
    resident = ({"pipeline_mode": pl.Buffered(1)} if single_buffer_resident else {})
    return pl.pallas_call(
        projector_kernel,
        out_shape=jax.ShapeDtypeStruct((M, N2p), out_dtype),
        grid_spec=pltpu.PrefetchScalarGridSpec(
            num_scalar_prefetch=0,
            grid=(pl.cdiv(M, tm), pl.cdiv(N2p, tn)),
            in_specs=[
                pl.BlockSpec((tm, K), lambda i, j: (i, 0)),               # x row tile
                pl.BlockSpec((K, N1p), lambda i, j: (0, 0), **resident),  # W1 resident
                pl.BlockSpec((1, N1p), lambda i, j: (0, 0), **resident),  # b1 resident
                pl.BlockSpec((N1p, tn), lambda i, j: (0, j)),             # W2 column tile
                pl.BlockSpec((1, tn), lambda i, j: (0, j)),               # b2 column tile
            ],
            out_specs=pl.BlockSpec((tm, tn), lambda i, j: (i, j)),
            scratch_shapes=[pltpu.VMEM((tm, N1p), w2.dtype)],             # post-GELU h
        ),
        compiler_params=pltpu.CompilerParams(
            dimension_semantics=("parallel", "arbitrary"),
            vmem_limit_bytes=vmem_limit,
        ),
    )(x2d, w1, b1, w2, b2)


def _fused_projector_2d(x2d, w1, b1, w2, b2, *, out_dtype, n_out):
    """x2d: (M, K) compute dtype.  w1: (K, N1p), b1: (1, N1p) f32,
    w2: (N1p, N2p), b2: (1, N2p) f32 (all pre-padded to 128-multiples)."""
    M, K = x2d.shape
    N1p = w1.shape[1]
    N2p = w2.shape[1]

    # ---- M tile: big for MXU rows; if the tile count is odd (>1), retile so
    # the "parallel" grid axis splits evenly across v7x's two TensorCores.
    tm = min(256, _round_up(M, 16))
    num_m = pl.cdiv(M, tm)
    if num_m > 1 and num_m % 2 == 1:
        for target in (num_m - 1, num_m + 1):          # prefer fewer, bigger tiles
            cand = _round_up(pl.cdiv(M, target), 16)
            if 16 <= cand <= 512 and pl.cdiv(M, cand) % 2 == 0:
                tm = cand
                break

    # ---- N2 tile: as big as this generation's VMEM allows (W2 is streamed).
    capacity = _vmem_capacity_bytes()
    budget = int(0.9 * capacity)
    headroom = 8 << 20
    tn = min(1024 if capacity >= (100 << 20) else 512, N2p)

    def need(tn_):
        # Conservative: assume double-buffered resident W1/b1 as well.
        return (2 * _nbytes((tm, K), x2d.dtype)
                + 2 * _nbytes((K, N1p), w1.dtype)
                + 2 * _nbytes((1, N1p), b1.dtype)
                + 2 * _nbytes((N1p, tn_), w2.dtype)
                + 2 * _nbytes((1, tn_), b2.dtype)
                + 2 * _nbytes((tm, tn_), out_dtype)
                + _nbytes((tm, N1p), w2.dtype))

    while need(tn) + headroom > budget and tn > 128:
        tn //= 2
    vmem_limit = int(min(max(need(tn) + headroom, 32 << 20), budget))
    # TODO(synk): stream W1 over a K grid axis only if in_hidden grows far
    # beyond ~2048; at LLaVA sizes the resident (single-buffered) W1 is cheaper.

    kwargs = dict(tm=tm, tn=tn, out_dtype=out_dtype, vmem_limit=vmem_limit)
    try:
        out = _call_projector(x2d, w1, b1, w2, b2,
                              single_buffer_resident=True, **kwargs)
    except Exception:
        # Some jax builds may reject pl.Buffered(1) on the main-grid pipeline;
        # fall back to default (double) buffering for the resident operands.
        out = _call_projector(x2d, w1, b1, w2, b2,
                              single_buffer_resident=False, **kwargs)

    return out[:, :n_out] if N2p != n_out else out


# ---------------------------------------------------------------------------
# Module-equivalent wrapper
# ---------------------------------------------------------------------------
class LlavaMultiModalProjectorPallas:
    """Weights stored in bf16 by default (param_dtype=jnp.bfloat16): matmul
    operands are bf16, biases and accumulation are f32, output keeps the input
    dtype.  Pass param_dtype=jnp.float32 for full-precision weights."""

    def __init__(self, in_hidden_size, out_hidden_size, conv_kernel=None,
                 conv_stride=3, *, key=None, param_dtype=jnp.bfloat16):
        self.in_hidden_size = in_hidden_size
        self.out_hidden_size = out_hidden_size
        self.conv_kernel = conv_kernel
        self.conv_stride = conv_stride
        self.param_dtype = param_dtype
        if key is None:
            key = jax.random.PRNGKey(0)
        k1, k2, k3, k4 = jax.random.split(key, 4)

        if conv_kernel:
            # Conv1d weight: (C_out, C_in, K)
            self.w1_conv = (jax.random.normal(
                k1, (out_hidden_size, in_hidden_size, conv_kernel),
                dtype=jnp.float32) * 0.02).astype(param_dtype)
            w1_mat = self.w1_conv.reshape(
                out_hidden_size, in_hidden_size * conv_kernel).T
        else:
            # Linear weight: torch is (out, in); store transposed (in, out)
            self.w1_lin = (jax.random.normal(
                k1, (in_hidden_size, out_hidden_size),
                dtype=jnp.float32) * 0.02).astype(param_dtype)
            w1_mat = self.w1_lin
        # Biases stay f32 (they are added to the f32 accumulator).
        self.b1 = jax.random.normal(k2, (1, out_hidden_size), jnp.float32) * 0.02
        self.w2 = (jax.random.normal(
            k3, (out_hidden_size, out_hidden_size),
            dtype=jnp.float32) * 0.02).astype(param_dtype)
        self.b2 = jax.random.normal(k4, (1, out_hidden_size), jnp.float32) * 0.02

        # ---- pad ONCE at init to lane-dense 128-multiples (stable kernel args).
        n1 = n2 = out_hidden_size
        n1p, n2p = _round_up(n1, 128), _round_up(n2, 128)
        self.w1p = jnp.pad(w1_mat, ((0, 0), (0, n1p - n1)))
        self.b1p = jnp.pad(self.b1, ((0, 0), (0, n1p - n1)))
        self.w2p = jnp.pad(self.w2, ((0, n1p - n1), (0, n2p - n2)))
        self.b2p = jnp.pad(self.b2, ((0, 0), (0, n2p - n2)))

    def __call__(self, image_features):
        out_dtype = image_features.dtype
        cdt = self.w1p.dtype                 # compute (storage-operand) dtype
        if self.conv_kernel:
            # conv mode, input layout NCW: (B, C_in, L)
            B, C_in, L = image_features.shape
            K, S = self.conv_kernel, self.conv_stride
            L_out = (L - K) // S + 1
            # im2col without gather: one NCW->NLC transpose (lane-dense C last),
            # then K strided slices stacked on a trailing axis.
            x_nlc = jnp.transpose(image_features, (0, 2, 1))            # (B, L, C_in)
            cols = [x_nlc[:, k:k + S * (L_out - 1) + 1:S, :] for k in range(K)]
            patches = jnp.stack(cols, axis=-1)                          # (B, L_out, C_in, K)
            x2d = patches.reshape(B * L_out, C_in * K).astype(cdt)
            out2d = _fused_projector_2d(
                x2d, self.w1p, self.b1p, self.w2p, self.b2p,
                out_dtype=out_dtype, n_out=self.out_hidden_size)
            # equals torch's conv1d(...).transpose(1, 2): (B, L_out, C_out)
            return out2d.reshape(B, L_out, self.out_hidden_size)
        else:
            # linear mode, input (B, S, in_hidden)
            B, S, D = image_features.shape
            x2d = image_features.reshape(B * S, D).astype(cdt)
            out2d = _fused_projector_2d(
                x2d, self.w1p, self.b1p, self.w2p, self.b2p,
                out_dtype=out_dtype, n_out=self.out_hidden_size)
            return out2d.reshape(B, S, self.out_hidden_size)

    # pure-JAX reference for verification (f32 chain on the same stored params)
    def reference(self, image_features):
        def gelu(x):
            return 0.5 * x * (1.0 + jax.lax.erf(x / jnp.sqrt(2.0)))
        if self.conv_kernel:
            h = jax.lax.conv_general_dilated(
                image_features.astype(jnp.float32),
                self.w1_conv.astype(jnp.float32),
                window_strides=(self.conv_stride,), padding="VALID",
                dimension_numbers=("NCH", "OIH", "NCH"))
            h = h + self.b1.astype(jnp.float32)[0][None, :, None]
            h = jnp.transpose(h, (0, 2, 1))          # (B, L_out, C_out)
        else:
            h = image_features.astype(jnp.float32) @ self.w1_lin.astype(jnp.float32) \
                + self.b1.astype(jnp.float32)[0]
        h = gelu(h)
        return h @ self.w2.astype(jnp.float32) + self.b2.astype(jnp.float32)[0]


if __name__ == "__main__":
    key = jax.random.PRNGKey(0)
    kx1, kx2, kp1, kp2 = jax.random.split(key, 4)

    # ---- linear mode: image_features (B, S, in_hidden) ----
    B, S, IN, OUT = 2, 8, 32, 32
    x_lin = jax.random.normal(kx1, (B, S, IN), dtype=jnp.float32)
    proj_lin = LlavaMultiModalProjectorPallas(IN, OUT, conv_kernel=None, key=kp1)
    y_lin = jax.block_until_ready(proj_lin(x_lin))
    y_lin_ref = proj_lin.reference(x_lin)
    assert y_lin.shape == (B, S, OUT)
    assert y_lin.dtype == x_lin.dtype
    # bf16 storage operands (x / hidden rounding) vs. pure-f32 reference chain.
    assert jnp.allclose(y_lin, y_lin_ref, atol=5e-3, rtol=1e-2), \
        float(jnp.max(jnp.abs(y_lin - y_lin_ref)))

    # ---- conv mode: image_features (B, C_in, L), NCW ----
    B, C_IN, L, OUT, KER, STR = 2, 32, 16, 32, 4, 3
    x_conv = jax.random.normal(kx2, (B, C_IN, L), dtype=jnp.float32)
    proj_conv = LlavaMultiModalProjectorPallas(C_IN, OUT, conv_kernel=KER,
                                               conv_stride=STR, key=kp2)
    y_conv = jax.block_until_ready(proj_conv(x_conv))
    y_conv_ref = proj_conv.reference(x_conv)
    L_out = (L - KER) // STR + 1
    assert y_conv.shape == (B, L_out, OUT)
    assert jnp.allclose(y_conv, y_conv_ref, atol=5e-3, rtol=1e-2), \
        float(jnp.max(jnp.abs(y_conv - y_conv_ref)))

    print("KERNEL_OK")
</pallas_src>

<mosaic_0001>
module attributes {stable_mosaic.version = 11 : i64} {
  func.func @projector_kernel(%arg0: i32, %arg1: i32, %arg2: memref<16x32xbf16, #tpu.memory_space<vmem>>, %arg3: memref<32x128xbf16, #tpu.memory_space<vmem>>, %arg4: memref<1x128xf32, #tpu.memory_space<vmem>>, %arg5: memref<128x128xbf16, #tpu.memory_space<vmem>>, %arg6: memref<1x128xf32, #tpu.memory_space<vmem>>, %arg7: memref<16x128xf32, #tpu.memory_space<vmem>>, %arg8: memref<16x128xbf16, #tpu.memory_space<vmem>>) attributes {dimension_semantics = [#tpu.dimension_semantics<parallel>, #tpu.dimension_semantics<arbitrary>], iteration_bounds = array<i64: 1, 1>, scalar_prefetch = 0 : i64, scratch_operands = 1 : i64, tpu.core_type = #tpu.core_type<tc>, window_params = [{transform_indices = @transform_0, window_bounds = array<i64: 16, 32>}, {pipeline_mode = #tpu.pipeline_mode<synchronous>, transform_indices = @transform_1, window_bounds = array<i64: 32, 128>}, {pipeline_mode = #tpu.pipeline_mode<synchronous>, transform_indices = @transform_2, window_bounds = array<i64: 1, 128>}, {transform_indices = @transform_3, window_bounds = array<i64: 128, 128>}, {transform_indices = @transform_4, window_bounds = array<i64: 1, 128>}, {transform_indices = @transform_5, window_bounds = array<i64: 16, 128>}]} {
    %c0_i32 = arith.constant 0 : i32
    %0 = arith.cmpi eq, %arg1, %c0_i32 : i32
    %1 = arith.extui %0 : i1 to i32
    %c0_i32_0 = arith.constant 0 : i32
    %2 = arith.cmpi ne, %1, %c0_i32_0 : i32
    scf.if %2 {
      %c0_8 = arith.constant 0 : index
      %c0_9 = arith.constant 0 : index
      %10 = vector.load %arg2[%c0_8, %c0_9] : memref<16x32xbf16, #tpu.memory_space<vmem>>, vector<16x32xbf16>
      %c0_10 = arith.constant 0 : index
      %c0_11 = arith.constant 0 : index
      %11 = vector.load %arg3[%c0_10, %c0_11] : memref<32x128xbf16, #tpu.memory_space<vmem>>, vector<32x128xbf16>
      %cst_12 = arith.constant dense<0.000000e+00> : vector<16x128xf32>
      %12 = tpu.matmul %10, %11, %cst_12 {dimension_numbers = #tpu.dot_dimension_numbers<[1], [0], [0], [1], [0, 0, 1, 1], [], []>} : vector<16x32xbf16>, vector<32x128xbf16>, vector<16x128xf32> -> vector<16x128xf32>
      %c0_13 = arith.constant 0 : index
      %c0_14 = arith.constant 0 : index
      %13 = vector.load %arg4[%c0_13, %c0_14] : memref<1x128xf32, #tpu.memory_space<vmem>>, vector<1x128xf32>
      %14 = vector.broadcast %13 : vector<1x128xf32> to vector<16x128xf32>
      %15 = arith.addf %12, %14 : vector<16x128xf32>
      %cst_15 = arith.constant 5.000000e-01 : f32
      %16 = vector.broadcast %cst_15 : f32 to vector<16x128xf32>
      %17 = arith.mulf %16, %15 : vector<16x128xf32>
      %cst_16 = arith.constant 0.707106769 : f32
      %18 = vector.broadcast %cst_16 : f32 to vector<16x128xf32>
      %19 = arith.mulf %15, %18 : vector<16x128xf32>
      %20 = math.erf %19 : vector<16x128xf32>
      %cst_17 = arith.constant 1.000000e+00 : f32
      %21 = vector.broadcast %cst_17 : f32 to vector<16x128xf32>
      %22 = arith.addf %21, %20 : vector<16x128xf32>
      %23 = arith.mulf %17, %22 : vector<16x128xf32>
      %24 = arith.truncf %23 : vector<16x128xf32> to vector<16x128xbf16>
      %c0_18 = arith.constant 0 : index
      %c0_19 = arith.constant 0 : index
      %25 = vector.load %arg8[%c0_18, %c0_19] : memref<16x128xbf16, #tpu.memory_space<vmem>>, vector<16x128xbf16>
      tpu.vector_store %arg8[%c0_18, %c0_19], %24 {strides = array<i32>} : memref<16x128xbf16, #tpu.memory_space<vmem>>, vector<16x128xbf16>,
    } else {
    }
    %c0 = arith.constant 0 : index
    %c0_1 = arith.constant 0 : index
    %3 = vector.load %arg8[%c0, %c0_1] : memref<16x128xbf16, #tpu.memory_space<vmem>>, vector<16x128xbf16>
    %c0_2 = arith.constant 0 : index
    %c0_3 = arith.constant 0 : index
    %4 = vector.load %arg5[%c0_2, %c0_3] : memref<128x128xbf16, #tpu.memory_space<vmem>>, vector<128x128xbf16>
    %cst = arith.constant dense<0.000000e+00> : vector<16x128xf32>
    %5 = tpu.matmul %3, %4, %cst {dimension_numbers = #tpu.dot_dimension_numbers<[1], [0], [0], [1], [0, 0, 1, 1], [], []>} : vector<16x128xbf16>, vector<128x128xbf16>, vector<16x128xf32> -> vector<16x128xf32>
    %c0_4 = arith.constant 0 : index
    %c0_5 = arith.constant 0 : index
    %6 = vector.load %arg6[%c0_4, %c0_5] : memref<1x128xf32, #tpu.memory_space<vmem>>, vector<1x128xf32>
    %7 = vector.broadcast %6 : vector<1x128xf32> to vector<16x128xf32>
    %8 = arith.addf %5, %7 : vector<16x128xf32>
    %c0_6 = arith.constant 0 : index
    %c0_7 = arith.constant 0 : index
    %9 = vector.load %arg7[%c0_6, %c0_7] : memref<16x128xf32, #tpu.memory_space<vmem>>, vector<16x128xf32>
    tpu.vector_store %arg7[%c0_6, %c0_7], %8 {strides = array<i32>} : memref<16x128xf32, #tpu.memory_space<vmem>>, vector<16x128xf32>,
    return
  }
  func.func @transform_0(%arg0: i32, %arg1: i32) -> (i32, i32) {
    %c0_i32 = arith.constant 0 : i32
    %c0_i32_0 = arith.constant 0 : i32
    return %arg0, %c0_i32 : i32, i32
  }
  func.func @transform_1(%arg0: i32, %arg1: i32) -> (i32, i32) {
    %c0_i32 = arith.constant 0 : i32
    %c0_i32_0 = arith.constant 0 : i32
    %c0_i32_1 = arith.constant 0 : i32
    return %c0_i32, %c0_i32_0 : i32, i32
  }
  func.func @transform_2(%arg0: i32, %arg1: i32) -> (i32, i32) {
    %c0_i32 = arith.constant 0 : i32
    %c0_i32_0 = arith.constant 0 : i32
    %c0_i32_1 = arith.constant 0 : i32
    return %c0_i32, %c0_i32_0 : i32, i32
  }
  func.func @transform_3(%arg0: i32, %arg1: i32) -> (i32, i32) {
    %c0_i32 = arith.constant 0 : i32
    %c0_i32_0 = arith.constant 0 : i32
    return %c0_i32, %arg1 : i32, i32
  }
  func.func @transform_4(%arg0: i32, %arg1: i32) -> (i32, i32) {
    %c0_i32 = arith.constant 0 : i32
    %c0_i32_0 = arith.constant 0 : i32
    return %c0_i32, %arg1 : i32, i32
  }
  func.func @transform_5(%arg0: i32, %arg1: i32) -> (i32, i32) {
    %c0_i32 = arith.constant 0 : i32
    return %arg0, %arg1 : i32, i32
  }
}

module attributes {stable_mosaic.version = 11 : i64} {
  func.func @projector_kernel(%arg0: i32, %arg1: i32, %arg2: memref<16x32xbf16, #tpu.memory_space<vmem>>, %arg3: memref<32x128xbf16, #tpu.memory_space<vmem>>, %arg4: memref<1x128xf32, #tpu.memory_space<vmem>>, %arg5: memref<128x128xbf16, #tpu.memory_space<vmem>>, %arg6: memref<1x128xf32, #tpu.memory_space<vmem>>, %arg7: memref<16x128xf32, #tpu.memory_space<vmem>>, %arg8: memref<16x128xbf16, #tpu.memory_space<vmem>>) attributes {dimension_semantics = [#tpu.dimension_semantics<parallel>, #tpu.dimension_semantics<arbitrary>], iteration_bounds = array<i64: 1, 1>, scalar_prefetch = 0 : i64, scratch_operands = 1 : i64, tpu.core_type = #tpu.core_type<tc>, window_params = [{transform_indices = @transform_0, window_bounds = array<i64: 16, 32>}, {pipeline_mode = #tpu.pipeline_mode<synchronous>, transform_indices = @transform_1, window_bounds = array<i64: 32, 128>}, {pipeline_mode = #tpu.pipeline_mode<synchronous>, transform_indices = @transform_2, window_bounds = array<i64: 1, 128>}, {transform_indices = @transform_3, window_bounds = array<i64: 128, 128>}, {transform_indices = @transform_4, window_bounds = array<i64: 1, 128>}, {transform_indices = @transform_5, window_bounds = array<i64: 16, 128>}]} {
    %c0_i32 = arith.constant 0 : i32
    %0 = arith.cmpi eq, %arg1, %c0_i32 : i32
    %1 = arith.extui %0 : i1 to i32
    %c0_i32_0 = arith.constant 0 : i32
    %2 = arith.cmpi ne, %1, %c0_i32_0 : i32
    scf.if %2 {
      %c0_8 = arith.constant 0 : index
      %c0_9 = arith.constant 0 : index
      %10 = vector.load %arg2[%c0_8, %c0_9] : memref<16x32xbf16, #tpu.memory_space<vmem>>, vector<16x32xbf16>
      %c0_10 = arith.constant 0 : index
      %c0_11 = arith.constant 0 : index
      %11 = vector.load %arg3[%c0_10, %c0_11] : memref<32x128xbf16, #tpu.memory_space<vmem>>, vector<32x128xbf16>
      %cst_12 = arith.constant dense<0.000000e+00> : vector<16x128xf32>
      %12 = tpu.matmul %10, %11, %cst_12 {dimension_numbers = #tpu.dot_dimension_numbers<[1], [0], [0], [1], [0, 0, 1, 1], [], []>} : vector<16x32xbf16>, vector<32x128xbf16>, vector<16x128xf32> -> vector<16x128xf32>
      %c0_13 = arith.constant 0 : index
      %c0_14 = arith.constant 0 : index
      %13 = vector.load %arg4[%c0_13, %c0_14] : memref<1x128xf32, #tpu.memory_space<vmem>>, vector<1x128xf32>
      %14 = vector.broadcast %13 : vector<1x128xf32> to vector<16x128xf32>
      %15 = arith.addf %12, %14 : vector<16x128xf32>
      %cst_15 = arith.constant 5.000000e-01 : f32
      %16 = vector.broadcast %cst_15 : f32 to vector<16x128xf32>
      %17 = arith.mulf %16, %15 : vector<16x128xf32>
      %cst_16 = arith.constant 0.707106769 : f32
      %18 = vector.broadcast %cst_16 : f32 to vector<16x128xf32>
      %19 = arith.mulf %15, %18 : vector<16x128xf32>
      %20 = math.erf %19 : vector<16x128xf32>
      %cst_17 = arith.constant 1.000000e+00 : f32
      %21 = vector.broadcast %cst_17 : f32 to vector<16x128xf32>
      %22 = arith.addf %21, %20 : vector<16x128xf32>
      %23 = arith.mulf %17, %22 : vector<16x128xf32>
      %24 = arith.truncf %23 : vector<16x128xf32> to vector<16x128xbf16>
      %c0_18 = arith.constant 0 : index
      %c0_19 = arith.constant 0 : index
      %25 = vector.load %arg8[%c0_18, %c0_19] : memref<16x128xbf16, #tpu.memory_space<vmem>>, vector<16x128xbf16>
      tpu.vector_store %arg8[%c0_18, %c0_19], %24 {strides = array<i32>} : memref<16x128xbf16, #tpu.memory_space<vmem>>, vector<16x128xbf16>,
    } else {
    }
    %c0 = arith.constant 0 : index
    %c0_1 = arith.constant 0 : index
    %3 = vector.load %arg8[%c0, %c0_1] : memref<16x128xbf16, #tpu.memory_space<vmem>>, vector<16x128xbf16>
    %c0_2 = arith.constant 0 : index
    %c0_3 = arith.constant 0 : index
    %4 = vector.load %arg5[%c0_2, %c0_3] : memref<128x128xbf16, #tpu.memory_space<vmem>>, vector<128x128xbf16>
    %cst = arith.constant dense<0.000000e+00> : vector<16x128xf32>
    %5 = tpu.matmul %3, %4, %cst {dimension_numbers = #tpu.dot_dimension_numbers<[1], [0], [0], [1], [0, 0, 1, 1], [], []>} : vector<16x128xbf16>, vector<128x128xbf16>, vector<16x128xf32> -> vector<16x128xf32>
    %c0_4 = arith.constant 0 : index
    %c0_5 = arith.constant 0 : index
    %6 = vector.load %arg6[%c0_4, %c0_5] : memref<1x128xf32, #tpu.memory_space<vmem>>, vector<1x128xf32>
    %7 = vector.broadcast %6 : vector<1x128xf32> to vector<16x128xf32>
    %8 = arith.addf %5, %7 : vector<16x128xf32>
    %c0_6 = arith.constant 0 : index
    %c0_7 = arith.constant 0 : index
    %9 = vector.load %arg7[%c0_6, %c0_7] : memref<16x128xf32, #tpu.memory_space<vmem>>, vector<16x128xf32>
    tpu.vector_store %arg7[%c0_6, %c0_7], %8 {strides = array<i32>} : memref<16x128xf32, #tpu.memory_space<vmem>>, vector<16x128xf32>,
    return
  }
  func.func @transform_0(%arg0: i32, %arg1: i32) -> (i32, i32) {
    %c0_i32 = arith.constant 0 : i32
    %c0_i32_0 = arith.constant 0 : i32
    return %arg0, %c0_i32 : i32, i32
  }
  func.func @transform_1(%arg0: i32, %arg1: i32) -> (i32, i32) {
    %c0_i32 = arith.constant 0 : i32
    %c0_i32_0 = arith.constant 0 : i32
    %c0_i32_1 = arith.constant 0 : i32
    return %c0_i32, %c0_i32_0 : i32, i32
  }
  func.func @transform_2(%arg0: i32, %arg1: i32) -> (i32, i32) {
    %c0_i32 = arith.constant 0 : i32
    %c0_i32_0 = arith.constant 0 : i32
    %c0_i32_1 = arith.constant 0 : i32
    return %c0_i32, %c0_i32_0 : i32, i32
  }
  func.func @transform_3(%arg0: i32, %arg1: i32) -> (i32, i32) {
    %c0_i32 = arith.constant 0 : i32
    %c0_i32_0 = arith.constant 0 : i32
    return %c0_i32, %arg1 : i32, i32
  }
  func.func @transform_4(%arg0: i32, %arg1: i32) -> (i32, i32) {
    %c0_i32 = arith.constant 0 : i32
    %c0_i32_0 = arith.constant 0 : i32
    return %c0_i32, %arg1 : i32, i32
  }
  func.func @transform_5(%arg0: i32, %arg1: i32) -> (i32, i32) {
    %c0_i32 = arith.constant 0 : i32
    return %arg0, %arg1 : i32, i32
  }
}

</mosaic_0001>

<bundles_post_ra>
// kernel: tpu_custom_call.1
= control target key start
LH: loop header
LB: loop body
LE: loop exit
PB: predicated region body
PF: predicated region fallthrough
CT: control target
= control target key end

     0   :  { %10 = vsyncpa [#allocation4], 0  ;;  %s536_s0 = inlined_call_operand.hbm [shape: bf16[16,32], index: 0, kind: input, shape index: {}]   ;;  %s537_s1 = inlined_call_operand.hbm [shape: bf16[32,128], index: 1, kind: input, shape index: {}]   ;;  %s538_s2 = inlined_call_operand.vmem [shape: f32[1,128], index: 2, kind: input, shape index: {}]   ;;  %s539_s3 = inlined_call_operand.hbm [shape: bf16[128,128], index: 3, kind: input, shape index: {}]   ;;  %s540_s4 = inlined_call_operand.vmem [shape: f32[1,128], index: 4, kind: input, shape index: {}]   ;;  %s541_s5 = inlined_call_operand.hbm [shape: f32[16,128], index: 5, kind: output, shape index: {}]  }
   0x1   :  { %11 = vsyncpa [#allocation7], 0 }
   0x2   :  { %12 = vsyncpa [#allocation5], 0  ;;  %s478_s18 = smov [#allocation6]   ;;  %s479_s20 = smov [#allocation3]  }
   0x3   :  { %s30_s19 = sshll.u32 %s478_s18, 4  ;;  %s18_s21 = sshll.u32 %s479_s20, 4  ;;  %s31_s19 = int_to_ptr.vmem [resolvable:$true] %s30_s19  ;;  %s19_s21 = int_to_ptr.vmem [resolvable:$true] %s18_s21 }
   0x4   :  { %s400_s22 = scalar_lea.vmem %s31_s19, 256  ;;  %p405_p1 = scmp.lt.s32.totalorder %s31_s19, %s31_s19 }
   0x5   :  { %p401_p0 = scmp.ne.s32.totalorder %s31_s19, %s400_s22  ;;  %p406_p2 = scmp.lt.s32.totalorder %s400_s22, %s400_s22 }
   0x7   :  { %p407_p3 = por %p406_p2, %p405_p1 }
   0x9   :  { %p408_p4 = pnand %p407_p3, %p401_p0 }
   0xb   :  { %411 = shalt.err (!%p408_p4)
}
   0xc   :  { %s480_s23 = smov 64   ;;  %s481_s24 = smov 4  }
   0xd   :  { %36 = dma.hbm_to_vmem [thread:$0]  %s537_s1, 256, %s31_s19, [#allocation7], %s480_s23, %s480_s23, %s481_s24  }
   0xe   :  { %s420_s27 = scalar_lea.vmem %s19_s21, 128  ;;  %p425_p6 = scmp.lt.s32.totalorder %s19_s21, %s19_s21 }
   0xf   :  { %p421_p5 = scmp.ne.s32.totalorder %s19_s21, %s420_s27  ;;  %p426_p7 = scmp.lt.s32.totalorder %s420_s27, %s420_s27 }
  0x11   :  { %p427_p8 = por %p426_p7, %p425_p6 }
  0x13   :  { %p428_p9 = pnand %p427_p8, %p421_p5 }
  0x15   :  { %431 = shalt.err (!%p428_p9)
}
  0x16   :  { %24 = dma.hbm_to_vmem [thread:$0]  %s536_s0, 128, %s19_s21, [#allocation4], %s480_s23, %s480_s23, %s481_s24  }
  0x17   :  { %s482_s30 = smov [#allocation8]  }
  0x18   :  { %s44_s6 = sshll.u32 %s482_s30, 4  ;;  %s45_s6 = int_to_ptr.vmem [resolvable:$true] %s44_s6 }
  0x19   :  { %s440_s7 = scalar_lea.vmem %s45_s6, 1024  ;;  %p445_p11 = scmp.lt.s32.totalorder %s45_s6, %s45_s6 }
  0x1a   :  { %p441_p10 = scmp.ne.s32.totalorder %s45_s6, %s440_s7  ;;  %p446_p12 = scmp.lt.s32.totalorder %s440_s7, %s440_s7 }
  0x1c   :  { %p447_p13 = por %p446_p12, %p445_p11 }
  0x1e   :  { %p448_p0 = pnand %p447_p13, %p441_p10 }
  0x20   :  { %451 = shalt.err (!%p448_p0)
}
  0x21   :  { %50 = dma.hbm_to_vmem [thread:$0]  %s539_s3, 1024, %s45_s6, [#allocation7], %s480_s23, %s480_s23, %s481_s24  }
  0x22   :  { %472 = dma.done.wait [#allocation4], 128  }
  0x23   :  { %473 = vsyncadd [#allocation4], 4294967168 }
  0x24   :  { %474 = dma.done.wait [#allocation7], 1280  }
  0x25   :  { %475 = vsyncadd [#allocation7], 4294966016  ;;  %v483_v0 = vmov 0.0   ;;  %vm484_vm0 = vmmov 0   ;;  %v376_v1 = vld [vmem:[#allocation6 + $0x8] sm:$0xff]   ;;  %v377_v2 = vld [vmem:[#allocation6] sm:$0xff]  }
  0x26   :  { %338 = vmatprep.subr.bf16.mxu0 %v483_v0  ;;  %342 = vmatprep.mubr.msk.bf16.mxu0 %vm484_vm0, %v483_v0  ;;  %v378_v3 = vld [vmem:[#allocation3] sm:$0xff]   ;;  %vm97_vm1 = vcmask 261120   ;;  %v379_v4 = vld [vmem:[#allocation8 + $0x38] sm:$0xff]   ;;  %v380_v5 = vld [vmem:[#allocation8 + $0x30] sm:$0xff]   ;;  %s485_s10 = smov [#allocation9]  }
  0x27   :  { %346 = vmatprep.subr.bf16.mxu1 %v483_v0  ;;  %362 = vmatprep.mubr.msk.bf16.mxu1 %vm484_vm0, %v483_v0  ;;  %v381_v6 = vld [vmem:[#allocation8 + $0x28] sm:$0xff]   ;;  %v382_v7 = vld [vmem:[#allocation8 + $0x20] sm:$0xff]   ;;  %v383_v8 = vld [vmem:[#allocation8 + $0x18] sm:$0xff]   ;;  %s289_s11 = sshll.u32 %s485_s10, 4  ;;  %s290_s11 = int_to_ptr.vmem [resolvable:$true] %s289_s11 }
  0x28   :  { %339 = vmatpush3.bf16.msra.mxu0 %v376_v1  ;;  %347 = vmatpush3.bf16.msra.mxu1 %v379_v4  ;;  %v384_v9 = vld [vmem:[#allocation8 + $0x10] sm:$0xff]   ;;  %v385_v10 = vld [vmem:[#allocation8 + $0x8] sm:$0xff]   ;;  %v386_v11 = vld [vmem:[#allocation8] sm:$0xff]   ;;  %s452_s12 = scalar_lea.vmem %s290_s11, 256  ;;  %p457_p2 = scmp.lt.s32.totalorder %s290_s11, %s290_s11 }
  0x29   :  { %340 = vmatprep.subr.bf16.mxu0 %v483_v0  ;;  %348 = vmatprep.subr.bf16.mxu1 %v483_v0  ;;  %v302_v12 = vld [vmem:[%s538_s2] ss:$0 sm:$0xff]  ;;  %p453_p1 = scmp.ne.s32.totalorder %s290_s11, %s452_s12  ;;  %p458_p3 = scmp.lt.s32.totalorder %s452_s12, %s452_s12 }
  0x2a   :  { %v309_v31 = vld [vmem:[%s540_s4] ss:$0 sm:$0xff] }
  0x2b   :  { %p459_p4 = por %p458_p3, %p457_p2 }
  0x2c   :  { %341 = vmatpush3.bf16.msra.mxu0 %v377_v2  ;;  %349 = vmatpush3.bf16.msra.mxu1 %v380_v5 }
  0x2d   :  { %350 = vmatprep.subr.bf16.mxu1 %v483_v0  ;;  %p460_p5 = pnand %p459_p4, %p453_p1 }
  0x2f   :  { %343 = vmatmul.mubr.msk.bf16.vlgmr.msra.gmra.mxu0 %vm97_vm1, %v378_v3 }
  0x30   :  { %351 = vmatpush3.bf16.msra.mxu1 %v381_v6 }
  0x31   :  { %352 = vmatprep.subr.bf16.mxu1 %v483_v0 }
  0x34   :  { %353 = vmatpush3.bf16.msra.mxu1 %v382_v7 }
  0x35   :  { %354 = vmatprep.subr.bf16.mxu1 %v483_v0 }
  0x38   :  { %355 = vmatpush3.bf16.msra.mxu1 %v383_v8 }
  0x39   :  { %356 = vmatprep.subr.bf16.mxu1 %v483_v0 }
  0x3c   :  { %357 = vmatpush3.bf16.msra.mxu1 %v384_v9 }
  0x3d   :  { %358 = vmatprep.subr.bf16.mxu1 %v483_v0 }
  0x40   :  { %359 = vmatpush3.bf16.msra.mxu1 %v385_v10 }
  0x41   :  { %360 = vmatprep.subr.bf16.mxu1 %v483_v0 }
  0x44   :  { %361 = vmatpush3.bf16.msra.mxu1 %v386_v11 }
  0xef   :  { %v135_v13 = vpop.f32.mrf.mxu0 }
  0xf0   :  { %v136_v14 = vadd.f32 %v302_v12, %v135_v13 }
  0xf1   :  { %v344_v15 = vpop.f32.mrf.mxu0 }
  0xf2   :  { %v144_v16 = vmul.f32 0.70710677, %v136_v14  ;;  %v142_v24 = vmul.f32 0.5, %v136_v14 }
  0xf3   :  { %v138_v17 = vpop.f32.mrf.mxu0 }
  0xf4   :  { %388 = verf.f32 %v144_v16  ;;  %v139_v18 = vadd.f32 %v302_v12, %v138_v17 }
  0xf5   :  { %v345_v19 = vpop.f32.mrf.mxu0 }
  0xf6   :  { %v145_v20 = vmul.f32 0.70710677, %v139_v18  ;;  %v143_v25 = vmul.f32 0.5, %v139_v18 }
  0xf8   :  { %390 = verf.f32 %v145_v20 }
 0x101   :  { %v389_v21 = vpop.eup %388 }
 0x102   :  { %v148_v22 = vadd.f32 1.0, %v389_v21 }
 0x104   :  { %v150_v27 = vmul.f32 %v148_v22, %v142_v24 }
 0x105   :  { %v391_v23 = vpop.eup %390 }
 0x106   :  { %v149_v26 = vadd.f32 1.0, %v391_v23 }
 0x108   :  { %v151_v28 = vmul.f32 %v149_v26, %v143_v25 }
 0x10a   :  { %v324_v29 = vpack.c.bf16 %v151_v28, %v150_v27 }
 0x10c   :  { %325 = vst [vmem:[#allocation2] sm:$0xff] %v324_v29  }
 0x113   :  { %v387_v30 = vld [vmem:[#allocation2] sm:$0xff]  }
 0x114   :  { %363 = vmatmul.mubr.bf16.vlgmr.msra.gmra.mxu1 %v387_v30 }
 0x1d4   :  { %v275_v32 = vpop.f32.mrf.mxu1 }
 0x1d5   :  { %v276_v33 = vadd.f32 %v309_v31, %v275_v32 }
 0x1d6   :  { %v364_v34 = vpop.f32.mrf.mxu1 }
 0x1d7   :  { %282 = vst [vmem:[#allocation9] sm:$0xff] %v276_v33 }
 0x1d8   :  { %v278_v35 = vpop.f32.mrf.mxu1 }
 0x1d9   :  { %v279_v36 = vadd.f32 %v309_v31, %v278_v35 }
 0x1da   :  { %v365_v37 = vpop.f32.mrf.mxu1 }
 0x1db   :  { %283 = vst [vmem:[#allocation9 + $0x8] sm:$0xff] %v279_v36 }
 0x1dc   :  { %463 = shalt.err (!%p460_p5)
}
 0x1dd   :  { %s486_s13 = smov 128   ;;  %s487_s4 = smov 8  }
 0x1de   :  { %295 = dma.vmem_to_hbm [thread:$0]  %s290_s11, 256, %s541_s5, [#allocation5], %s486_s13, %s486_s13, %s487_s4  }
 0x1df   :  { %476 = dma.done.wait [#allocation5], 256  }
 0x1e0   :  { %477 = vsyncadd [#allocation5], 4294967040 }
 0x1e1   :  { %299 = vsyncpa [#allocation4], 1 }
 0x1e2   :  { %300 = vsyncpa [#allocation7], 1 }
 0x1e3   :  { %301 = vsyncpa [#allocation5], 1 }

// kernel: tpu_custom_call.1
= control target key start
LH: loop header
LB: loop body
LE: loop exit
PB: predicated region body
PF: predicated region fallthrough
CT: control target
= control target key end

     0   :  { %10 = vsyncpa [#allocation4], 0  ;;  %s536_s0 = inlined_call_operand.hbm [shape: bf16[16,32], index: 0, kind: input, shape index: {}]   ;;  %s537_s1 = inlined_call_operand.hbm [shape: bf16[32,128], index: 1, kind: input, shape index: {}]   ;;  %s538_s2 = inlined_call_operand.vmem [shape: f32[1,128], index: 2, kind: input, shape index: {}]   ;;  %s539_s3 = inlined_call_operand.hbm [shape: bf16[128,128], index: 3, kind: input, shape index: {}]   ;;  %s540_s4 = inlined_call_operand.vmem [shape: f32[1,128], index: 4, kind: input, shape index: {}]   ;;  %s541_s5 = inlined_call_operand.hbm [shape: f32[16,128], index: 5, kind: output, shape index: {}]  }
   0x1   :  { %11 = vsyncpa [#allocation7], 0 }
   0x2   :  { %12 = vsyncpa [#allocation5], 0  ;;  %s478_s18 = smov [#allocation6]   ;;  %s479_s20 = smov [#allocation3]  }
   0x3   :  { %s30_s19 = sshll.u32 %s478_s18, 4  ;;  %s18_s21 = sshll.u32 %s479_s20, 4  ;;  %s31_s19 = int_to_ptr.vmem [resolvable:$true] %s30_s19  ;;  %s19_s21 = int_to_ptr.vmem [resolvable:$true] %s18_s21 }
   0x4   :  { %s400_s22 = scalar_lea.vmem %s31_s19, 256  ;;  %p405_p1 = scmp.lt.s32.totalorder %s31_s19, %s31_s19 }
   0x5   :  { %p401_p0 = scmp.ne.s32.totalorder %s31_s19, %s400_s22  ;;  %p406_p2 = scmp.lt.s32.totalorder %s400_s22, %s400_s22 }
   0x7   :  { %p407_p3 = por %p406_p2, %p405_p1 }
   0x9   :  { %p408_p4 = pnand %p407_p3, %p401_p0 }
   0xb   :  { %411 = shalt.err (!%p408_p4)
}
   0xc   :  { %s480_s23 = smov 64   ;;  %s481_s24 = smov 4  }
   0xd   :  { %36 = dma.hbm_to_vmem [thread:$0]  %s537_s1, 256, %s31_s19, [#allocation7], %s480_s23, %s480_s23, %s481_s24  }
   0xe   :  { %s420_s27 = scalar_lea.vmem %s19_s21, 128  ;;  %p425_p6 = scmp.lt.s32.totalorder %s19_s21, %s19_s21 }
   0xf   :  { %p421_p5 = scmp.ne.s32.totalorder %s19_s21, %s420_s27  ;;  %p426_p7 = scmp.lt.s32.totalorder %s420_s27, %s420_s27 }
  0x11   :  { %p427_p8 = por %p426_p7, %p425_p6 }
  0x13   :  { %p428_p9 = pnand %p427_p8, %p421_p5 }
  0x15   :  { %431 = shalt.err (!%p428_p9)
}
  0x16   :  { %24 = dma.hbm_to_vmem [thread:$0]  %s536_s0, 128, %s19_s21, [#allocation4], %s480_s23, %s480_s23, %s481_s24  }
  0x17   :  { %s482_s30 = smov [#allocation8]  }
  0x18   :  { %s44_s6 = sshll.u32 %s482_s30, 4  ;;  %s45_s6 = int_to_ptr.vmem [resolvable:$true] %s44_s6 }
  0x19   :  { %s440_s7 = scalar_lea.vmem %s45_s6, 1024  ;;  %p445_p11 = scmp.lt.s32.totalorder %s45_s6, %s45_s6 }
  0x1a   :  { %p441_p10 = scmp.ne.s32.totalorder %s45_s6, %s440_s7  ;;  %p446_p12 = scmp.lt.s32.totalorder %s440_s7, %s440_s7 }
  0x1c   :  { %p447_p13 = por %p446_p12, %p445_p11 }
  0x1e   :  { %p448_p0 = pnand %p447_p13, %p441_p10 }
  0x20   :  { %451 = shalt.err (!%p448_p0)
}
  0x21   :  { %50 = dma.hbm_to_vmem [thread:$0]  %s539_s3, 1024, %s45_s6, [#allocation7], %s480_s23, %s480_s23, %s481_s24  }
  0x22   :  { %472 = dma.done.wait [#allocation4], 128  }
  0x23   :  { %473 = vsyncadd [#allocation4], 4294967168 }
  0x24   :  { %474 = dma.done.wait [#allocation7], 1280  }
  0x25   :  { %475 = vsyncadd [#allocation7], 4294966016  ;;  %v483_v0 = vmov 0.0   ;;  %vm484_vm0 = vmmov 0   ;;  %v376_v1 = vld [vmem:[#allocation6 + $0x8] sm:$0xff]   ;;  %v377_v2 = vld [vmem:[#allocation6] sm:$0xff]  }
  0x26   :  { %338 = vmatprep.subr.bf16.mxu0 %v483_v0  ;;  %342 = vmatprep.mubr.msk.bf16.mxu0 %vm484_vm0, %v483_v0  ;;  %v378_v3 = vld [vmem:[#allocation3] sm:$0xff]   ;;  %vm97_vm1 = vcmask 261120   ;;  %v379_v4 = vld [vmem:[#allocation8 + $0x38] sm:$0xff]   ;;  %v380_v5 = vld [vmem:[#allocation8 + $0x30] sm:$0xff]   ;;  %s485_s10 = smov [#allocation9]  }
  0x27   :  { %346 = vmatprep.subr.bf16.mxu1 %v483_v0  ;;  %362 = vmatprep.mubr.msk.bf16.mxu1 %vm484_vm0, %v483_v0  ;;  %v381_v6 = vld [vmem:[#allocation8 + $0x28] sm:$0xff]   ;;  %v382_v7 = vld [vmem:[#allocation8 + $0x20] sm:$0xff]   ;;  %v383_v8 = vld [vmem:[#allocation8 + $0x18] sm:$0xff]   ;;  %s289_s11 = sshll.u32 %s485_s10, 4  ;;  %s290_s11 = int_to_ptr.vmem [resolvable:$true] %s289_s11 }
  0x28   :  { %339 = vmatpush3.bf16.msra.mxu0 %v376_v1  ;;  %347 = vmatpush3.bf16.msra.mxu1 %v379_v4  ;;  %v384_v9 = vld [vmem:[#allocation8 + $0x10] sm:$0xff]   ;;  %v385_v10 = vld [vmem:[#allocation8 + $0x8] sm:$0xff]   ;;  %v386_v11 = vld [vmem:[#allocation8] sm:$0xff]   ;;  %s452_s12 = scalar_lea.vmem %s290_s11, 256  ;;  %p457_p2 = scmp.lt.s32.totalorder %s290_s11, %s290_s11 }
  0x29   :  { %340 = vmatprep.subr.bf16.mxu0 %v483_v0  ;;  %348 = vmatprep.subr.bf16.mxu1 %v483_v0  ;;  %v302_v12 = vld [vmem:[%s538_s2] ss:$0 sm:$0xff]  ;;  %p453_p1 = scmp.ne.s32.totalorder %s290_s11, %s452_s12  ;;  %p458_p3 = scmp.lt.s32.totalorder %s452_s12, %s452_s12 }
  0x2a   :  { %v309_v31 = vld [vmem:[%s540_s4] ss:$0 sm:$0xff] }
  0x2b   :  { %p459_p4 = por %p458_p3, %p457_p2 }
  0x2c   :  { %341 = vmatpush3.bf16.msra.mxu0 %v377_v2  ;;  %349 = vmatpush3.bf16.msra.mxu1 %v380_v5 }
  0x2d   :  { %350 = vmatprep.subr.bf16.mxu1 %v483_v0  ;;  %p460_p5 = pnand %p459_p4, %p453_p1 }
  0x2f   :  { %343 = vmatmul.mubr.msk.bf16.vlgmr.msra.gmra.mxu0 %vm97_vm1, %v378_v3 }
  0x30   :  { %351 = vmatpush3.bf16.msra.mxu1 %v381_v6 }
  0x31   :  { %352 = vmatprep.subr.bf16.mxu1 %v483_v0 }
  0x34   :  { %353 = vmatpush3.bf16.msra.mxu1 %v382_v7 }
  0x35   :  { %354 = vmatprep.subr.bf16.mxu1 %v483_v0 }
  0x38   :  { %355 = vmatpush3.bf16.msra.mxu1 %v383_v8 }
  0x39   :  { %356 = vmatprep.subr.bf16.mxu1 %v483_v0 }
  0x3c   :  { %357 = vmatpush3.bf16.msra.mxu1 %v384_v9 }
  0x3d   :  { %358 = vmatprep.subr.bf16.mxu1 %v483_v0 }
  0x40   :  { %359 = vmatpush3.bf16.msra.mxu1 %v385_v10 }
  0x41   :  { %360 = vmatprep.subr.bf16.mxu1 %v483_v0 }
  0x44   :  { %361 = vmatpush3.bf16.msra.mxu1 %v386_v11 }
  0xef   :  { %v135_v13 = vpop.f32.mrf.mxu0 }
  0xf0   :  { %v136_v14 = vadd.f32 %v302_v12, %v135_v13 }
  0xf1   :  { %v344_v15 = vpop.f32.mrf.mxu0 }
  0xf2   :  { %v144_v16 = vmul.f32 0.70710677, %v136_v14  ;;  %v142_v24 = vmul.f32 0.5, %v136_v14 }
  0xf3   :  { %v138_v17 = vpop.f32.mrf.mxu0 }
  0xf4   :  { %388 = verf.f32 %v144_v16  ;;  %v139_v18 = vadd.f32 %v302_v12, %v138_v17 }
  0xf5   :  { %v345_v19 = vpop.f32.mrf.mxu0 }
  0xf6   :  { %v145_v20 = vmul.f32 0.70710677, %v139_v18  ;;  %v143_v25 = vmul.f32 0.5, %v139_v18 }
  0xf8   :  { %390 = verf.f32 %v145_v20 }
 0x101   :  { %v389_v21 = vpop.eup %388 }
 0x102   :  { %v148_v22 = vadd.f32 1.0, %v389_v21 }
 0x104   :  { %v150_v27 = vmul.f32 %v148_v22, %v142_v24 }
 0x105   :  { %v391_v23 = vpop.eup %390 }
 0x106   :  { %v149_v26 = vadd.f32 1.0, %v391_v23 }
 0x108   :  { %v151_v28 = vmul.f32 %v149_v26, %v143_v25 }
 0x10a   :  { %v324_v29 = vpack.c.bf16 %v151_v28, %v150_v27 }
 0x10c   :  { %325 = vst [vmem:[#allocation2] sm:$0xff] %v324_v29  }
 0x113   :  { %v387_v30 = vld [vmem:[#allocation2] sm:$0xff]  }
 0x114   :  { %363 = vmatmul.mubr.bf16.vlgmr.msra.gmra.mxu1 %v387_v30 }
 0x1d4   :  { %v275_v32 = vpop.f32.mrf.mxu1 }
 0x1d5   :  { %v276_v33 = vadd.f32 %v309_v31, %v275_v32 }
 0x1d6   :  { %v364_v34 = vpop.f32.mrf.mxu1 }
 0x1d7   :  { %282 = vst [vmem:[#allocation9] sm:$0xff] %v276_v33 }
 0x1d8   :  { %v278_v35 = vpop.f32.mrf.mxu1 }
 0x1d9   :  { %v279_v36 = vadd.f32 %v309_v31, %v278_v35 }
 0x1da   :  { %v365_v37 = vpop.f32.mrf.mxu1 }
 0x1db   :  { %283 = vst [vmem:[#allocation9 + $0x8] sm:$0xff] %v279_v36 }
 0x1dc   :  { %463 = shalt.err (!%p460_p5)
}
 0x1dd   :  { %s486_s13 = smov 128   ;;  %s487_s4 = smov 8  }
 0x1de   :  { %295 = dma.vmem_to_hbm [thread:$0]  %s290_s11, 256, %s541_s5, [#allocation5], %s486_s13, %s486_s13, %s487_s4  }
 0x1df   :  { %476 = dma.done.wait [#allocation5], 256  }
 0x1e0   :  { %477 = vsyncadd [#allocation5], 4294967040 }
 0x1e1   :  { %299 = vsyncpa [#allocation4], 1 }
 0x1e2   :  { %300 = vsyncpa [#allocation7], 1 }
 0x1e3   :  { %301 = vsyncpa [#allocation5], 1 }

</bundles_post_ra>
